<compile_context>
chip_gen: v7x
topology: tpu7x:2x2x1
jax: 0.10.0
libtpu: 0.0.40
codegen_flags: <defaults>
</compile_context>

<pallas_src>
import functools

import jax
import jax.numpy as jnp
from jax.experimental import pallas as pl
from jax.experimental.pallas import tpu as pltpu

_EPS = 1e-6


def _round_up(x, m):
    return ((x + m - 1) // m) * m


def _vmem_budget_bytes():
    """Scoped-VMEM budget we are willing to request (generation-aware)."""
    phys = 64 << 20  # conservative default = v7x per-TensorCore VMEM
    try:
        info = pltpu.get_tpu_info()
        cap = getattr(info, "vmem_capacity_bytes", None)
        if cap:
            phys = int(cap)
    except Exception:
        pass
    return min(phys // 2, 32 << 20)


# ---------------------------------------------------------------------------
# Single-pass kernel: full T / full D resident per block of Bb batch rows.
# ---------------------------------------------------------------------------
def _grn_single_pass_kernel(x_ref, gamma_ref, beta_ref, o_ref, *, inv_d):
    xf = x_ref[...].astype(jnp.float32)                        # (Bb, T, Dp)
    gx = jnp.sqrt(jnp.sum(xf * xf, axis=1, keepdims=True))     # (Bb, 1, Dp)
    # Mean over the *original* D lanes (padded lanes contribute 0 to the sum).
    mean = jnp.sum(gx, axis=-1, keepdims=True) * inv_d         # (Bb, 1, 1)
    nx = gx / (mean + _EPS)
    scale = gamma_ref[...].astype(jnp.float32) * nx + 1.0      # (Bb, 1, Dp)
    beta = beta_ref[...].astype(jnp.float32)                   # (1, 1, Dp)
    o_ref[...] = (xf * scale + beta).astype(o_ref.dtype)


# ---------------------------------------------------------------------------
# Two-pass fallback: pass 1 computes scale = gamma*Nx + 1 per (b, d),
# pass 2 applies y = x*scale + beta elementwise.
# ---------------------------------------------------------------------------
def _grn_scale_kernel(x_ref, gamma_ref, scale_ref, *, inv_d, t_actual, t_block):
    t = pl.program_id(1)

    @pl.when(t == 0)
    def _():
        scale_ref[...] = jnp.zeros_like(scale_ref)

    xf = x_ref[...].astype(jnp.float32)                        # (1, Tt, Dp)
    if t_actual % t_block != 0:
        # Mask rows of the ragged last T tile so stale data never reaches
        # the sum of squares.
        row = jax.lax.broadcasted_iota(jnp.int32, xf.shape, 1) + t * t_block
        xf = jnp.where(row < t_actual, xf, 0.0)
    scale_ref[...] += jnp.sum(xf * xf, axis=1, keepdims=True)  # (1, 1, Dp)

    @pl.when(t == pl.num_programs(1) - 1)
    def _():
        gx = jnp.sqrt(scale_ref[...])                          # (1, 1, Dp)
        mean = jnp.sum(gx, axis=-1, keepdims=True) * inv_d
        nx = gx / (mean + _EPS)
        scale_ref[...] = gamma_ref[...].astype(jnp.float32) * nx + 1.0


def _grn_apply_kernel(x_ref, scale_ref, beta_ref, o_ref):
    xf = x_ref[...].astype(jnp.float32)                        # (1, Tt, Dp)
    o_ref[...] = (xf * scale_ref[...]
                  + beta_ref[...].astype(jnp.float32)).astype(o_ref.dtype)


# ---------------------------------------------------------------------------
# Wrapper
# ---------------------------------------------------------------------------
def grn_pallas(x, gamma, beta, *, target_block_bytes=None, force_two_pass=False):
    """x: (B, T, D); gamma, beta: broadcastable to (1, 1, D). Returns (B, T, D)."""
    B, T, D = x.shape
    itemsize = jnp.dtype(x.dtype).itemsize
    sub = 8 if itemsize >= 4 else 16       # sublane packing (f32 vs bf16)

    vmem_budget = _vmem_budget_bytes()
    vmem_limit = int(vmem_budget)
    if target_block_bytes is None:
        # in + out blocks, each double-buffered ~= 4x block; leave slack.
        target_block_bytes = max(1 << 20, vmem_budget // 8)
    single_pass_limit = max(target_block_bytes, vmem_budget // 6)

    # Lane-dense feature axis: zero-pad D up to a multiple of 128.
    Dp = _round_up(D, 128)
    g = gamma.reshape(1, 1, D)
    b = beta.reshape(1, 1, D)
    xp = x
    if Dp != D:
        pad = ((0, 0), (0, 0), (0, Dp - D))
        xp = jnp.pad(x, pad)
        g = jnp.pad(g, pad)
        b = jnp.pad(b, pad)

    inv_d = 1.0 / D
    row_bytes = T * Dp * itemsize

    if not force_two_pass and row_bytes <= single_pass_limit:
        # ------------------ single-pass path ------------------
        Bb = max(1, min(B, target_block_bytes // max(row_bytes, 1)))
        # Keep >= 2 (ideally >= 4) grid steps so both v7x TensorCores get work
        # and the DMA pipeline (prefetch i+1 / writeback i-1) stays full.
        if B >= 4:
            Bb = min(Bb, B // 4)
        elif B >= 2:
            Bb = min(Bb, B // 2)
        Bb = max(Bb, 1)

        cost = pl.CostEstimate(
            flops=5 * B * T * Dp,
            transcendentals=B * Dp,
            bytes_accessed=2 * B * T * Dp * itemsize + 2 * Dp * 4,
        )
        out = pl.pallas_call(
            functools.partial(_grn_single_pass_kernel, inv_d=inv_d),
            out_shape=jax.ShapeDtypeStruct((B, T, Dp), x.dtype),
            grid_spec=pltpu.PrefetchScalarGridSpec(
                num_scalar_prefetch=0,
                grid=(pl.cdiv(B, Bb),),
                in_specs=[
                    pl.BlockSpec((Bb, T, Dp), lambda i: (i, 0, 0)),
                    pl.BlockSpec((1, 1, Dp), lambda i: (0, 0, 0)),
                    pl.BlockSpec((1, 1, Dp), lambda i: (0, 0, 0)),
                ],
                out_specs=pl.BlockSpec((Bb, T, Dp), lambda i: (i, 0, 0)),
            ),
            compiler_params=pltpu.CompilerParams(
                dimension_semantics=("parallel",),
                vmem_limit_bytes=vmem_limit,
            ),
            cost_estimate=cost,
        )(xp, g, b)
    else:
        # ------------------ two-pass T-tiled fallback ------------------
        Tt = max(sub, (target_block_bytes // (Dp * itemsize)) // sub * sub)
        if Tt >= T:
            Tt = T                      # full extent is always a legal block dim
        nT = pl.cdiv(T, Tt)
        grid = (B, nT)

        cost1 = pl.CostEstimate(
            flops=3 * B * T * Dp,
            transcendentals=B * Dp,
            bytes_accessed=B * T * Dp * itemsize + B * Dp * 4 + Dp * 4,
        )
        scale = pl.pallas_call(
            functools.partial(_grn_scale_kernel, inv_d=inv_d,
                              t_actual=T, t_block=Tt),
            out_shape=jax.ShapeDtypeStruct((B, 1, Dp), jnp.float32),
            grid_spec=pltpu.PrefetchScalarGridSpec(
                num_scalar_prefetch=0,
                grid=grid,
                in_specs=[
                    pl.BlockSpec((1, Tt, Dp), lambda i, t: (i, t, 0)),
                    pl.BlockSpec((1, 1, Dp), lambda i, t: (0, 0, 0)),
                ],
                out_specs=pl.BlockSpec((1, 1, Dp), lambda i, t: (i, 0, 0)),
            ),
            compiler_params=pltpu.CompilerParams(
                dimension_semantics=("parallel", "arbitrary"),
                vmem_limit_bytes=vmem_limit,
            ),
            cost_estimate=cost1,
        )(xp, g)

        cost2 = pl.CostEstimate(
            flops=2 * B * T * Dp,
            transcendentals=0,
            bytes_accessed=2 * B * T * Dp * itemsize + B * Dp * 4 + Dp * 4,
        )
        out = pl.pallas_call(
            _grn_apply_kernel,
            out_shape=jax.ShapeDtypeStruct((B, T, Dp), x.dtype),
            grid_spec=pltpu.PrefetchScalarGridSpec(
                num_scalar_prefetch=0,
                grid=grid,
                in_specs=[
                    pl.BlockSpec((1, Tt, Dp), lambda i, t: (i, t, 0)),
                    pl.BlockSpec((1, 1, Dp), lambda i, t: (i, 0, 0)),
                    pl.BlockSpec((1, 1, Dp), lambda i, t: (0, 0, 0)),
                ],
                out_specs=pl.BlockSpec((1, Tt, Dp), lambda i, t: (i, t, 0)),
            ),
            compiler_params=pltpu.CompilerParams(
                dimension_semantics=("parallel", "parallel"),
                vmem_limit_bytes=vmem_limit,
            ),
            cost_estimate=cost2,
        )(xp, scale, b)

    if Dp != D:
        out = out[:, :, :D]
    return out


def grn_ref(x, gamma, beta):
    """Pure-JAX reference mirroring the PyTorch forward."""
    xf = x.astype(jnp.float32)
    gx = jnp.sqrt(jnp.sum(xf * xf, axis=1, keepdims=True))          # (B, 1, D)
    nx = gx / (jnp.mean(gx, axis=-1, keepdims=True) + 1e-6)         # (B, 1, D)
    g = gamma.reshape(1, 1, -1).astype(jnp.float32)
    b = beta.reshape(1, 1, -1).astype(jnp.float32)
    return (g * (xf * nx) + b + xf).astype(x.dtype)


if __name__ == "__main__":
    key = jax.random.PRNGKey(0)
    kx, kg, kb, kx2 = jax.random.split(key, 4)

    # Primary test: shapes consistent with the module (batch=2, seq=8, dim=128).
    B, T, D = 2, 8, 128
    x = jax.random.normal(kx, (B, T, D), dtype=jnp.float32)
    # Module __init__ zero-inits gamma/beta; use small deterministic random
    # values so the GRN math is actually exercised.
    gamma = 0.1 * jax.random.normal(kg, (1, 1, D), dtype=jnp.float32)
    beta = 0.1 * jax.random.normal(kb, (1, 1, D), dtype=jnp.float32)

    out = jax.block_until_ready(grn_pallas(x, gamma, beta))
    expected = grn_ref(x, gamma, beta)
    assert out.shape == (B, T, D)
    assert jnp.allclose(out, expected, atol=1e-5, rtol=1e-5), (
        f"single-pass max abs err = {jnp.max(jnp.abs(out - expected))}"
    )

    # Secondary test: force the two-pass T-tiled fallback with a ragged T tile
    # and a non-128-multiple D so that code path is exercised at tiny shapes.
    B2, T2, D2 = 2, 20, 96
    x2 = jax.random.normal(kx2, (B2, T2, D2), dtype=jnp.float32)
    g2, b2 = gamma[..., :D2], beta[..., :D2]
    out2 = jax.block_until_ready(
        grn_pallas(x2, g2, b2, target_block_bytes=4096, force_two_pass=True))
    expected2 = grn_ref(x2, g2, b2)
    assert out2.shape == (B2, T2, D2)
    assert jnp.allclose(out2, expected2, atol=1e-5, rtol=1e-5), (
        f"two-pass max abs err = {jnp.max(jnp.abs(out2 - expected2))}"
    )

    print("KERNEL_OK")
</pallas_src>

<mosaic_0001>
module attributes {stable_mosaic.version = 11 : i64} {
  func.func @_grn_single_pass_kernel(%arg0: i32, %arg1: memref<1x8x128xf32, #tpu.memory_space<vmem>>, %arg2: memref<1x1x128xf32, #tpu.memory_space<vmem>>, %arg3: memref<1x1x128xf32, #tpu.memory_space<vmem>>, %arg4: memref<1x8x128xf32, #tpu.memory_space<vmem>>) attributes {dimension_semantics = [#tpu.dimension_semantics<parallel>], iteration_bounds = array<i64: 2>, scalar_prefetch = 0 : i64, scratch_operands = 0 : i64, tpu.core_type = #tpu.core_type<tc>, window_params = [{transform_indices = @transform_0, window_bounds = array<i64: 1, 8, 128>}, {pipeline_mode = #tpu.pipeline_mode<synchronous>, transform_indices = @transform_1, window_bounds = array<i64: 1, 1, 128>}, {pipeline_mode = #tpu.pipeline_mode<synchronous>, transform_indices = @transform_2, window_bounds = array<i64: 1, 1, 128>}, {transform_indices = @transform_3, window_bounds = array<i64: 1, 8, 128>}]} {
    %c0 = arith.constant 0 : index
    %c0_0 = arith.constant 0 : index
    %c0_1 = arith.constant 0 : index
    %0 = vector.load %arg1[%c0, %c0_0, %c0_1] : memref<1x8x128xf32, #tpu.memory_space<vmem>>, vector<1x8x128xf32>
    %1 = arith.mulf %0, %0 : vector<1x8x128xf32>
    %cst = arith.constant dense<0.000000e+00> : vector<1x128xf32>
    %2 = vector.multi_reduction <add>, %1, %cst [1] : vector<1x8x128xf32> to vector<1x128xf32>
    %3 = vector.shape_cast %2 : vector<1x128xf32> to vector<1x1x128xf32>
    %4 = math.sqrt %3 : vector<1x1x128xf32>
    %cst_2 = arith.constant dense<0.000000e+00> : vector<1x1xf32>
    %5 = vector.multi_reduction <add>, %4, %cst_2 [2] : vector<1x1x128xf32> to vector<1x1xf32>
    %6 = vector.shape_cast %5 : vector<1x1xf32> to vector<1x1x1xf32>
    %cst_3 = arith.constant 7.812500e-03 : f32
    %7 = vector.broadcast %cst_3 : f32 to vector<1x1x1xf32>
    %8 = arith.mulf %6, %7 : vector<1x1x1xf32>
    %cst_4 = arith.constant 9.99999997E-7 : f32
    %9 = vector.broadcast %cst_4 : f32 to vector<1x1x1xf32>
    %10 = arith.addf %8, %9 : vector<1x1x1xf32>
    %11 = vector.broadcast %10 : vector<1x1x1xf32> to vector<1x1x128xf32>
    %12 = arith.divf %4, %11 : vector<1x1x128xf32>
    %c0_5 = arith.constant 0 : index
    %c0_6 = arith.constant 0 : index
    %c0_7 = arith.constant 0 : index
    %13 = vector.load %arg2[%c0_5, %c0_6, %c0_7] : memref<1x1x128xf32, #tpu.memory_space<vmem>>, vector<1x1x128xf32>
    %14 = arith.mulf %13, %12 : vector<1x1x128xf32>
    %cst_8 = arith.constant 1.000000e+00 : f32
    %15 = vector.broadcast %cst_8 : f32 to vector<1x1x128xf32>
    %16 = arith.addf %14, %15 : vector<1x1x128xf32>
    %c0_9 = arith.constant 0 : index
    %c0_10 = arith.constant 0 : index
    %c0_11 = arith.constant 0 : index
    %17 = vector.load %arg3[%c0_9, %c0_10, %c0_11] : memref<1x1x128xf32, #tpu.memory_space<vmem>>, vector<1x1x128xf32>
    %18 = vector.broadcast %16 : vector<1x1x128xf32> to vector<1x8x128xf32>
    %19 = arith.mulf %0, %18 : vector<1x8x128xf32>
    %20 = vector.broadcast %17 : vector<1x1x128xf32> to vector<1x8x128xf32>
    %21 = arith.addf %19, %20 : vector<1x8x128xf32>
    %c0_12 = arith.constant 0 : index
    %c0_13 = arith.constant 0 : index
    %c0_14 = arith.constant 0 : index
    %22 = vector.load %arg4[%c0_12, %c0_13, %c0_14] : memref<1x8x128xf32, #tpu.memory_space<vmem>>, vector<1x8x128xf32>
    tpu.vector_store %arg4[%c0_12, %c0_13, %c0_14], %21 {strides = array<i32>} : memref<1x8x128xf32, #tpu.memory_space<vmem>>, vector<1x8x128xf32>,
    return
  }
  func.func @transform_0(%arg0: i32) -> (i32, i32, i32) {
    %c0_i32 = arith.constant 0 : i32
    %c0_i32_0 = arith.constant 0 : i32
    %c0_i32_1 = arith.constant 0 : i32
    return %arg0, %c0_i32, %c0_i32_0 : i32, i32, i32
  }
  func.func @transform_1(%arg0: i32) -> (i32, i32, i32) {
    %c0_i32 = arith.constant 0 : i32
    %c0_i32_0 = arith.constant 0 : i32
    %c0_i32_1 = arith.constant 0 : i32
    %c0_i32_2 = arith.constant 0 : i32
    return %c0_i32, %c0_i32_0, %c0_i32_1 : i32, i32, i32
  }
  func.func @transform_2(%arg0: i32) -> (i32, i32, i32) {
    %c0_i32 = arith.constant 0 : i32
    %c0_i32_0 = arith.constant 0 : i32
    %c0_i32_1 = arith.constant 0 : i32
    %c0_i32_2 = arith.constant 0 : i32
    return %c0_i32, %c0_i32_0, %c0_i32_1 : i32, i32, i32
  }
  func.func @transform_3(%arg0: i32) -> (i32, i32, i32) {
    %c0_i32 = arith.constant 0 : i32
    %c0_i32_0 = arith.constant 0 : i32
    %c0_i32_1 = arith.constant 0 : i32
    return %arg0, %c0_i32, %c0_i32_0 : i32, i32, i32
  }
}

</mosaic_0001>

<bundles_post_ra>
// kernel: tpu_custom_call.1
= control target key start
LH: loop header
LB: loop body
LE: loop exit
PB: predicated region body
PF: predicated region fallthrough
CT: control target
= control target key end

     0   :  { %8 = vsyncpa [#allocation3], 0  ;;  %s664_s0 = inlined_call_operand.hbm [shape: f32[2,8,128], index: 0, kind: input, shape index: {}]   ;;  %s665_s1 = inlined_call_operand.vmem [shape: f32[1,1,128], index: 1, kind: input, shape index: {}]   ;;  %s666_s2 = inlined_call_operand.vmem [shape: f32[1,1,128], index: 2, kind: input, shape index: {}]   ;;  %s667_s3 = inlined_call_operand.hbm [shape: f32[2,8,128], index: 3, kind: output, shape index: {}]  }
   0x1   :  { %10 = vsyncpa [#allocation3 + $0x1], 0 }
   0x2   :  { %11 = vsyncpa [#allocation4], 0 }
   0x3   :  { %13 = vsyncpa [#allocation4 + $0x1], 0  ;;  %s493_s12 = smov 0   ;;  %s495_s13 = smov 0  }
   0x4   :  { %s497_s14 = smov 0   ;;  %s499_s15 = smov 0  }
   0x5 LB: > { %s514_s16 = sadd.s32 4294967295, %s469_s15   ;;  %s310_s17 = sadd.s32 4294967294, %s469_s15   ;;  %s469_s15 = sphi %s499_s15, %s682_s15   ;;  %s465_s14 = sphi %s497_s14, %s681_s14   ;;  %s461_s13 = sphi %s495_s13, %s680_s13   ;;  %s457_s12 = sphi %s493_s12, %s679_s12  }
   0x6   : > { %s518_s18 = sadd.s32 1, %s469_s15   ;;  %s26_s19 = sadd.s32 1, %s465_s14 }
   0x7   : > { %s23_s20 = ssub.s32 %s469_s15, %s518_s18  ;;  %p33_p0 = scmp.ne.s32.totalorder %s465_s14, %s461_s13 }
   0x8   : > { %p24_p1 = scmp.eq.s32.totalorder %s23_s20, 0  ;;  %p34_p2 = scmp.eq.s32.totalorder %s469_s15, 0 }
   0x9   : > { %p39_p3 = scmp.ne.s32.totalorder %s461_s13, %s457_s12  ;;  %p40_p4 = scmp.eq.s32.totalorder %s514_s16, 0 }
   0xa   : > { %s530_s21 = scalar_select %p24_p1, %s465_s14, %s26_s19  }
   0xb   : > { %p532_p5 = por %p34_p2, %p33_p0  ;;  %p536_p6 = por %p40_p4, %p39_p3 }
   0xc   : > { %p105_p7 = scmp.eq.s32.totalorder %s514_s16, 1  ;;  %p111_p8 = scmp.eq.s32.totalorder %s310_s17, 1 }
   0xd   : > { %p335_p10 = scmp.lt.s32.totalorder %s469_s15, 2  ;;  %s137_s26 = sand.u32 1, %s465_s14  }
   0xe   : > { %p543_p11 = por %p105_p7, %p33_p0  ;;  %p547_p12 = por %p111_p8, %p39_p3 }
   0xf   : > { %s314_s27 = sshll.u32 %s469_s15, 7  ;;  %s313_s28 = sshll.u32 %s137_s26, 3 }
  0x10   : > { %s671_s24 = scalar_select %p543_p11, 1, 0 }
  0x11   : > { %s672_s25 = scalar_select %p547_p12, 1, 0 }
  0x12   : > { %s556_s4 = scalar_lea.hbm %s664_s0, %s314_s27  ;;  %s141_s5 = scalar_lea.vmem [#allocation2], %s313_s28 }
  0x13   : > { %s148_s6 = sshll.u32 %s141_s5, 4  ;;  %p560_p13 = pnand %p335_p10, %p532_p5  ;;  %s564_s6 = int_to_ptr.vmem [resolvable:$true] %s148_s6 }
  0x14   : > { %s138_s8 = scalar_lea.sflag [#allocation3], %s137_s26  ;;  %s373_s9 = scalar_lea.hbm %s556_s4, 128 }
  0x15   : > { %p374_p2 = scmp.ne.s32.totalorder %s556_s4, %s373_s9  ;;  %p375_p3 = pneg %p560_p13 }
  0x16   : > { %s378_s17 = scalar_lea.hbm %s664_s0, 256  ;;  %p379_p5 = scmp.lt.u32.totalorder %s556_s4, %s664_s0 }
  0x17   : > { %p376_p4 = pnand %p375_p3, %p374_p2  ;;  %p380_p8 = scmp.lt.u32.totalorder %s378_s17, %s373_s9 }
  0x18   : > { %p382_p9 = scmp.lt.u32.totalorder %s373_s9, %s556_s4 }
  0x19   : > { %p377_p7 = pneg %p376_p4  ;;  %p381_p10 = por %p380_p8, %p379_p5 }
  0x1b   : > { %p383_p0 = por %p382_p9, %p381_p10 }
  0x1d   : > { %p384_p1 = pnand %p383_p0, %p377_p7 }
  0x1f   : > { %387 = shalt.err (!%p384_p1)
}
  0x20   : > { %s388_s22 = scalar_lea.vmem %s564_s6, 128  ;;  %s471_s26 = smov [#allocation2]  }
  0x21   : > { %p389_p2 = scmp.ne.s32.totalorder %s564_s6, %s388_s22  ;;  %s393_s27 = sshll.u32 %s471_s26, 4  ;;  %s394_s27 = int_to_ptr.vmem [resolvable:$false] %s393_s27 }
  0x22   : > { %s395_s28 = scalar_lea.vmem %s394_s27, 256  ;;  %p396_p11 = scmp.lt.s32.totalorder %s564_s6, %s394_s27 }
  0x23   : > { %p391_p4 = pnand %p389_p2, %p375_p3  ;;  %p397_p5 = scmp.lt.s32.totalorder %s395_s28, %s388_s22 }
  0x25   : > { %p392_p12 = pneg %p391_p4  ;;  %p398_p8 = por %p397_p5, %p396_p11 }
  0x27   : > { %p399_p9 = pnand %p398_p8, %p392_p12 }
  0x29   : > { %402 = shalt.err (!%p399_p9)
}
  0x2a   : > { %330 = dma.hbm_to_vmem [thread:$0]  (!%p560_p13), %s556_s4, 128, %s564_s6, %s138_s8  }
  0x2b   : > { %p674_p0 = scmp.lt.s32.totalorder %s469_s15, 3  ;;  %p675_p1 = scmp.ge.s32.totalorder %s469_s15, 1 }
  0x2d   : > { %p154_p3 = pnand %p675_p1, %p674_p0 }
  0x2e   : > { %s598_s29 = sand.u32 (!%p154_p3), 1, %s461_s13  }
  0x2f   : > { %157 = sbr.rel (%p154_p3) target bundleno = 268 (0x10c), region = 32  ;;  %s316_s30 = sshll.u32 (!%p154_p3), %s598_s29, 3 }
  0x30   : > { %s160_s5 = scalar_lea.sflag (!%p154_p3), [#allocation3], %s598_s29  ;;  %s163_s7 = scalar_lea.vmem (!%p154_p3), [#allocation2], %s316_s30 }
  0x36   : > { %448 = dma.done.wait (%p536_p6), %s160_s5, 128  }
  0x37   : > { %450 = vsyncadd (%p536_p6), %s160_s5, 4294967168  ;;  %v186_v0 = vld [vmem:[%s163_s7] sm:$0xff]  ;;  %v212_v16 = vlaneseq  ;;  %s320_s9 = sshll.u32 %s514_s16, 7  ;;  %s185_s10 = scalar_lea.vmem [#allocation5], %s316_s30 }
  0x38   : > { %v187_v1 = vmul.f32 %v186_v0, %v186_v0  ;;  %v207_v19 = vld [vmem:[%s665_s1] sm:$0x1]  ;;  %s240_s11 = sshll.u32 %s185_s10, 4  ;;  %s620_s20 = scalar_lea.hbm %s667_s3, %s320_s9  ;;  %s622_s11 = int_to_ptr.vmem [resolvable:$true] %s240_s11 }
  0x39   : > { %v213_v17 = vshrl.u32 %v212_v16, 7  ;;  %v318_v25 = vld [vmem:[%s666_s2] ss:$0 sm:$0xff]  ;;  %s227_s22 = scalar_lea.sflag [#allocation4], %s598_s29  ;;  %s403_s26 = scalar_lea.vmem %s622_s11, 128 }
  0x3a   : > { %v188_v2 = vrot.slane %v187_v1, 4  ;;  %p404_p6 = scmp.ne.s32.totalorder %s622_s11, %s403_s26  ;;  %p676_p11 = scmp.ne.s32.totalorder %s671_s24, 0 }
  0x3b   : > { %v214_v22 = vsub.s32 0, %v213_v17  ;;  %s472_s16 = smov [#allocation5]  }
  0x3c   : > { %v189_v3 = vadd.f32 %v188_v2, %v187_v1  ;;  %p405_p12 = pnand %p404_p6, %p676_p11  ;;  %s407_s27 = sshll.u32 %s472_s16, 4  ;;  %s408_s27 = int_to_ptr.vmem [resolvable:$false] %s407_s27 }
  0x3d   : > { %s409_s28 = scalar_lea.vmem %s408_s27, 256  ;;  %p410_p7 = scmp.lt.s32.totalorder %s622_s11, %s408_s27 }
  0x3e   : > { %v190_v4 = vrot.slane %v189_v3, 2  ;;  %p406_p13 = pneg %p405_p12  ;;  %p411_p10 = scmp.lt.s32.totalorder %s409_s28, %s403_s26 }
  0x40   : > { %v191_v5 = vadd.f32 %v190_v4, %v189_v3  ;;  %p412_p2 = por %p411_p10, %p410_p7 }
  0x42   : > { %v192_v6 = vrot.slane %v191_v5, 1  ;;  %p413_p4 = pnand %p412_p2, %p406_p13 }
  0x44   : > { %v193_v7 = vadd.f32 %v192_v6, %v191_v5 }
  0x46   : > { %369 = vrsqrt.f32 %v193_v7  ;;  %vm196_vm0 = vcmp.eq.f32.partialorder %v193_v7, inf  ;;  %v199_v9 = vand.u32 2147483648, %v193_v7  ;;  %vm198_vm1 = vcmp.eq.f32.partialorder %v193_v7, 0.0 }
  0x50   : > { %v370_v8 = vpop.eup %369 }
  0x51   : > { %v195_v10 = vmul.f32 %v370_v8, %v193_v7 }
  0x53   : > { %v197_v11 = vsel %vm196_vm0, %v193_v7, %v195_v10 }
  0x54   : > { %v200_v12 = vsel %vm198_vm1, %v199_v9, %v197_v11 }
  0x55   : > { %201 = vadd.xlane.f32.xlu0 %v200_v12 }
  0xe2   : > { %v202_v13 = vpop.xlane.xlu0 %201 }
  0xe3   : > { %v203_v14 = vmul.f32 0.0078125, %v202_v13 }
  0xe5   : > { %v204_v15 = vadd.f32 1e-06, %v203_v14 }
  0xe7   : > { %371 = vrcp.f32 %v204_v15 }
  0xf1   : > { %v372_v18 = vpop.eup %371 }
  0xf2   : > { %v206_v20 = vmul.f32 %v372_v18, %v200_v12 }
  0xf4   : > { %v208_v21 = vmul.f32 %v207_v19, %v206_v20 }
  0xf6   : > { %v209_v23 = vadd.f32 1.0, %v208_v21 }
  0xf8   : > { %v215_v24 = vrot.slane %v209_v23, %v214_v22 }
  0xfa   : > { %v217_v26 = vmul.f32 %v215_v24, %v186_v0 }
  0xfc   : > { %v224_v27 = vadd.f32 %v318_v25, %v217_v26 }
  0xfe   : > { %225 = vst [vmem:[%s185_s10] sm:$0xff] %v224_v27 }
  0xff   : > { %416 = shalt.err (!%p413_p4)
}
 0x100   : > { %s417_s29 = scalar_lea.hbm %s620_s20, 128  ;;  %s421_s7 = scalar_lea.hbm %s667_s3, 256 }
 0x101   : > { %p418_p5 = scmp.ne.s32.totalorder %s620_s20, %s417_s29  ;;  %p422_p0 = scmp.lt.u32.totalorder %s620_s20, %s667_s3 }
 0x102   : > { %p423_p1 = scmp.lt.u32.totalorder %s421_s7, %s417_s29  ;;  %p425_p6 = scmp.lt.u32.totalorder %s417_s29, %s620_s20 }
 0x103   : > { %p419_p8 = pnand %p418_p5, %p676_p11 }
 0x104   : > { %p424_p3 = por %p423_p1, %p422_p0 }
 0x105   : > { %p420_p9 = pneg %p419_p8 }
 0x106   : > { %p426_p12 = por %p425_p6, %p424_p3 }
 0x108   : > { %p427_p13 = pnand %p426_p12, %p420_p9 }
 0x10a   : > { %430 = shalt.err (!%p427_p13)
}
 0x10b   : > { %325 = dma.vmem_to_hbm [thread:$0]  (%p676_p11), %s622_s11, 128, %s620_s20, %s227_s22  }
 0x10c PF: > { %s252_s6 = sand.u32 1, %s457_s12   ;;  %p677_p7 = scmp.ne.s32.totalorder %s672_s25, 0 }
 0x10d   : > { %p678_p10 = scmp.ge.s32.totalorder %s469_s15, 2  ;;  %s253_s8 = scalar_lea.sflag [#allocation4], %s252_s6 }
 0x10f   : > { %p332_p2 = pnand %p678_p10, %p677_p7 }
 0x111   : > { %452 = dma.done.wait (!%p332_p2), %s253_s8, 128  }
 0x112   : > { %454 = vsyncadd (!%p332_p2), %s253_s8, 4294967168  ;;  %p16_p4 = scmp.ge.s32.totalorder %s518_s18, 4   ;;  %s679_s12 = smov %s461_s13 }
 0x113   : > { %s680_s13 = smov %s465_s14  ;;  %s681_s14 = smov %s530_s21 }
 0x114   : > { %s682_s15 = smov %s518_s18  ;;  %18 = sbr.rel (!%p16_p4) target bundleno = 5 (0x5), region = 77 }
 0x11b   :  { %258 = vsyncpa [#allocation3], 1 }
 0x11c   :  { %260 = vsyncpa [#allocation3 + $0x1], 1 }
 0x11d   :  { %261 = vsyncpa [#allocation4], 1 }
 0x11e   :  { %263 = vsyncpa [#allocation4 + $0x1], 1 }

</bundles_post_ra>
